<compile_context>
chip_gen: v6e
topology: v6e:2x2x1
jax: 0.10.0
libtpu: 0.0.40
codegen_flags: <defaults>
</compile_context>

<pallas_src>
import jax
import jax.numpy as jnp
from jax.experimental import pallas as pl
from jax.experimental.pallas import tpu as pltpu


def _conv1x1_sigmoid_kernel(x_ref, w_ref, b_ref, o_ref):
    # MXU matmul: bf16 x bf16 -> f32 accumulation.
    acc = jnp.dot(x_ref[...], w_ref[...], preferred_element_type=jnp.float32)
    acc = acc + b_ref[...]  # f32 epilogue (keeps v5e happy: no bf16 VPU/EUP there)
    # sigmoid(acc) = 1 / (1 + exp(-acc)); exp on EUP, divide via approx vrcp (EUP slot).
    o_ref[...] = pl.reciprocal(1.0 + jnp.exp(-acc), approx=True).astype(o_ref.dtype)


def prepare_params(weight, bias):
    """One-time parameter prep (hoisted out of the per-call hot path).

    weight: (Cout, Cin, 1, 1) -> (Cin, Cout) bf16
    bias  : (Cout,)           -> (1, Cout)   f32
    """
    cout, cin = weight.shape[0], weight.shape[1]
    w2d = jnp.asarray(weight).reshape(cout, cin).T.astype(jnp.bfloat16)
    b2d = jnp.asarray(bias).reshape(1, cout).astype(jnp.float32)
    return w2d, b2d


def conv1x1_sigmoid(x_nchw, w2d, b2d):
    """x_nchw: (N, Cin, 1, 1); w2d: (Cin, Cout) bf16; b2d: (1, Cout) f32.

    Returns (N, Cout, 1, 1) f32. Works for any N (batch to amortize the
    weight fetch); the original module uses N = 1.
    """
    n, cin, h, w = x_nchw.shape
    assert h == 1 and w == 1, "module operates on 1x1 spatial maps"
    assert w2d.shape[0] == cin
    cout = w2d.shape[1]

    x2d = x_nchw.reshape(n, cin).astype(jnp.bfloat16)

    cost = pl.CostEstimate(
        flops=2 * n * cin * cout,
        transcendentals=n * cout,
        bytes_accessed=(
            w2d.size * 2      # bf16 weight
            + b2d.size * 4    # f32 bias
            + x2d.size * 2    # bf16 activation
            + n * cout * 4    # f32 output
        ),
    )

    out2d = pl.pallas_call(
        _conv1x1_sigmoid_kernel,
        out_shape=jax.ShapeDtypeStruct((n, cout), jnp.float32),
        # Tiny problem: whole-array blocks resident in VMEM, single grid point.
        in_specs=[
            pl.BlockSpec(memory_space=pltpu.VMEM),
            pl.BlockSpec(memory_space=pltpu.VMEM),
            pl.BlockSpec(memory_space=pltpu.VMEM),
        ],
        out_specs=pl.BlockSpec(memory_space=pltpu.VMEM),
        cost_estimate=cost,
    )(x2d, w2d, b2d)

    return out2d.reshape(n, cout, 1, 1)


if __name__ == "__main__":
    key = jax.random.PRNGKey(0)
    k_x, k_w, k_b = jax.random.split(key, 3)

    N, CIN, COUT = 1, 48, 1152

    # Deterministic synthetic parameters (shapes from Conv2d(48, 1152, 1)).
    x = jax.random.normal(k_x, (N, CIN, 1, 1), dtype=jnp.float32)
    weight = jax.random.normal(k_w, (COUT, CIN, 1, 1), dtype=jnp.float32) * (1.0 / CIN**0.5)
    bias = jax.random.normal(k_b, (COUT,), dtype=jnp.float32) * 0.01

    # Parameter prep happens ONCE (outside the hot path).
    w2d, b2d = prepare_params(weight, bias)

    out = conv1x1_sigmoid(x, w2d, b2d)
    out = jax.block_until_ready(out)

    # Reference in plain JAX using the same bf16-cast operands, so the only
    # remaining deltas are MXU rounding + the approx reciprocal.
    x_bf = x.reshape(N, CIN).astype(jnp.bfloat16).astype(jnp.float32)
    w_bf = w2d.astype(jnp.float32)
    ref = jax.nn.sigmoid(x_bf @ w_bf + b2d).reshape(N, COUT, 1, 1)

    assert out.shape == (N, COUT, 1, 1)
    assert jnp.allclose(out, ref, atol=2e-2, rtol=2e-2), (
        float(jnp.max(jnp.abs(out - ref)))
    )

    print("KERNEL_OK")
</pallas_src>

<mosaic_0001>
module attributes {stable_mosaic.version = 11 : i64} {
  func.func @_conv1x1_sigmoid_kernel(%arg0: memref<1x48xbf16, #tpu.memory_space<vmem>>, %arg1: memref<48x1152xbf16, #tpu.memory_space<vmem>>, %arg2: memref<1x1152xf32, #tpu.memory_space<vmem>>, %arg3: memref<1x1152xf32, #tpu.memory_space<vmem>>) attributes {dimension_semantics = [], scalar_prefetch = 0 : i64, scratch_operands = 0 : i64, tpu.core_type = #tpu.core_type<tc>} {
    %c0 = arith.constant 0 : index
    %c0_0 = arith.constant 0 : index
    %0 = vector.load %arg0[%c0, %c0_0] : memref<1x48xbf16, #tpu.memory_space<vmem>>, vector<1x48xbf16>
    %c0_1 = arith.constant 0 : index
    %c0_2 = arith.constant 0 : index
    %1 = vector.load %arg1[%c0_1, %c0_2] : memref<48x1152xbf16, #tpu.memory_space<vmem>>, vector<48x1152xbf16>
    %cst = arith.constant dense<0.000000e+00> : vector<1x1152xf32>
    %2 = tpu.matmul %0, %1, %cst {dimension_numbers = #tpu.dot_dimension_numbers<[1], [0], [0], [1], [0, 0, 1, 1], [], []>} : vector<1x48xbf16>, vector<48x1152xbf16>, vector<1x1152xf32> -> vector<1x1152xf32>
    %c0_3 = arith.constant 0 : index
    %c0_4 = arith.constant 0 : index
    %3 = vector.load %arg2[%c0_3, %c0_4] : memref<1x1152xf32, #tpu.memory_space<vmem>>, vector<1x1152xf32>
    %4 = arith.addf %2, %3 : vector<1x1152xf32>
    %cst_5 = arith.constant 0.000000e+00 : f32
    %5 = vector.broadcast %cst_5 : f32 to vector<1x1152xf32>
    %6 = arith.subf %5, %4 : vector<1x1152xf32>
    %7 = math.exp %6 : vector<1x1152xf32>
    %cst_6 = arith.constant 1.000000e+00 : f32
    %8 = vector.broadcast %cst_6 : f32 to vector<1x1152xf32>
    %9 = arith.addf %8, %7 : vector<1x1152xf32>
    %10 = tpu.reciprocal %9 {approx = true} : vector<1x1152xf32> -> vector<1x1152xf32>
    %c0_7 = arith.constant 0 : index
    %c0_8 = arith.constant 0 : index
    %11 = vector.load %arg3[%c0_7, %c0_8] : memref<1x1152xf32, #tpu.memory_space<vmem>>, vector<1x1152xf32>
    tpu.vector_store %arg3[%c0_7, %c0_8], %10 {strides = array<i32>} : memref<1x1152xf32, #tpu.memory_space<vmem>>, vector<1x1152xf32>,
    return
  }
}

</mosaic_0001>

<bundles_post_ra>
// kernel: tpu_custom_call.1
= control target key start
LH: loop header
LB: loop body
LE: loop exit
PB: predicated region body
PF: predicated region fallthrough
CT: control target
= control target key end

     0   :  { %8 = vsyncpa [#allocation3], 0  ;;  %s898_s0 = inlined_call_operand.hbm [shape: bf16[1,48], index: 0, kind: input, shape index: {}]   ;;  %s899_s1 = inlined_call_operand.hbm [shape: bf16[48,1152], index: 1, kind: input, shape index: {}]   ;;  %s900_s2 = inlined_call_operand.hbm [shape: f32[1,1152], index: 2, kind: input, shape index: {}]   ;;  %s901_s3 = inlined_call_operand.hbm [shape: f32[1,1152], index: 3, kind: output, shape index: {}]  }
   0x1   :  { %9 = vsyncpa [#allocation6], 0 }
   0x2   :  { %10 = vsyncpa [#allocation4], 0  ;;  %s838_s12 = smov [#allocation5]  }
   0x3   :  { %s26_s13 = sshll.u32 %s838_s12, 4  ;;  %s27_s13 = int_to_ptr.vmem [resolvable:$true] %s26_s13 }
   0x4   :  { %s760_s14 = scalar_lea.vmem %s27_s13, 3456  ;;  %p765_p1 = scmp.lt.s32.totalorder %s27_s13, %s27_s13 }
   0x5   :  { %p761_p0 = scmp.ne.s32.totalorder %s27_s13, %s760_s14  ;;  %p766_p2 = scmp.lt.s32.totalorder %s760_s14, %s760_s14 }
   0x7   :  { %p767_p3 = por %p766_p2, %p765_p1 }
   0x9   :  { %p768_p4 = pnand %p767_p3, %p761_p0 }
   0xb   :  { %771 = shalt.err (!%p768_p4)
}
   0xc   :  { %s839_s15 = smov 576   ;;  %s840_s16 = smov 36  }
   0xd   :  { %32 = dma.hbm_to_vmem [thread:$0]  %s899_s1, 3456, %s27_s13, [#allocation6], %s839_s15, %s839_s15, %s840_s16  }
   0xe   :  { %s841_s19 = smov [#allocation2]   ;;  %s842_s21 = smov [#allocation7]  }
   0xf   :  { %s17_s20 = sshll.u32 %s841_s19, 4  ;;  %s39_s22 = sshll.u32 %s842_s21, 4  ;;  %s18_s20 = int_to_ptr.vmem [resolvable:$true] %s17_s20  ;;  %s40_s22 = int_to_ptr.vmem [resolvable:$true] %s39_s22 }
  0x10   :  { %s780_s23 = scalar_lea.vmem %s18_s20, 16  ;;  %s784_s24 = scalar_lea.vmem %s18_s20, 32 }
  0x11   :  { %p781_p5 = scmp.ne.s32.totalorder %s18_s20, %s780_s23  ;;  %p785_p6 = scmp.lt.s32.totalorder %s18_s20, %s18_s20 }
  0x12   :  { %p786_p7 = scmp.lt.s32.totalorder %s784_s24, %s780_s23 }
  0x14   :  { %p787_p8 = por %p786_p7, %p785_p6 }
  0x16   :  { %p788_p9 = pnand %p787_p8, %p781_p5 }
  0x18   :  { %791 = shalt.err (!%p788_p9)
}
  0x19   :  { %20 = dma.hbm_to_vmem [thread:$0]  %s898_s0, 16, %s18_s20, [#allocation3]  }
  0x1a   :  { %s800_s27 = scalar_lea.vmem %s40_s22, 144  ;;  %s804_s1 = scalar_lea.vmem %s40_s22, 160 }
  0x1b   :  { %p801_p10 = scmp.ne.s32.totalorder %s40_s22, %s800_s27  ;;  %p805_p11 = scmp.lt.s32.totalorder %s40_s22, %s40_s22 }
  0x1c   :  { %p806_p12 = scmp.lt.s32.totalorder %s804_s1, %s800_s27 }
  0x1e   :  { %p807_p13 = por %p806_p12, %p805_p11 }
  0x20   :  { %p808_p0 = pnand %p807_p13, %p801_p10 }
  0x22   :  { %811 = shalt.err (!%p808_p0)
}
  0x23   :  { %42 = dma.hbm_to_vmem [thread:$0]  %s900_s2, 144, %s40_s22, [#allocation6]  }
  0x24   :  { %832 = dma.done.wait [#allocation3], 16  }
  0x25   :  { %833 = vsyncadd [#allocation3], 4294967280 }
  0x26   :  { %834 = dma.done.wait [#allocation6], 3600  }
  0x27   :  { %835 = vsyncadd [#allocation6], 4294963696  ;;  %v843_v0 = vmov 0   ;;  %v677_v1 = vld [vmem:[#allocation5 + $0x94] ss:$36 sps:$4 sm:$0xff]   ;;  %vm271_vm0 = vcmask 392192   ;;  %v226_v30 = vlaneseq }
  0x28   :  { %307 = vmatprep.mubr.bf16.mxu0 %v843_v0  ;;  %348 = vmatprep.mubr.bf16.mxu1 %v843_v0  ;;  %v679_v2 = vld [vmem:[#allocation5 + $0x9c] ss:$36 sps:$4 sm:$0xff]   ;;  %v681_v3 = vld [vmem:[#allocation5 + $0x90] ss:$36 sps:$4 sm:$0xff]   ;;  %v687_v7 = vld [vmem:[#allocation5 + $0x48] ss:$36 sps:$4 sm:$0xff]  }
  0x29   :  { %285 = vmatprep.subr.bf16.mxu0 %v677_v1  ;;  %v682_v4 = vld [vmem:[#allocation5 + $0x98] ss:$36 sps:$4 sm:$0xff]   ;;  %326 = vmatprep.subr.bf16.mxu1 %v679_v2  ;;  %v683_v5 = vld [vmem:[#allocation5 + $0x4c] ss:$36 sps:$4 sm:$0xff]   ;;  %v689_v9 = vld [vmem:[#allocation5 + $0x4] ss:$36 sps:$4 sm:$0xff]  }
  0x2a   :  { %286 = vmatpush1.bf16.msra.mxu0 %v681_v3  ;;  %327 = vmatpush1.bf16.msra.mxu1 %v682_v4  ;;  %v685_v6 = vld [vmem:[#allocation5 + $0x54] ss:$36 sps:$4 sm:$0xff]   ;;  %v691_v10 = vld [vmem:[#allocation5 + $0xc] ss:$36 sps:$4 sm:$0xff]   ;;  %v693_v11 = vld [vmem:[#allocation5] ss:$36 sps:$4 sm:$0xff]  }
  0x2b   :  { %287 = vmatprep.subr.bf16.mxu0 %v683_v5  ;;  %v688_v8 = vld [vmem:[#allocation5 + $0x50] ss:$36 sps:$4 sm:$0xff]   ;;  %328 = vmatprep.subr.bf16.mxu1 %v685_v6  ;;  %v694_v12 = vld [vmem:[#allocation5 + $0x8] ss:$36 sps:$4 sm:$0xff]   ;;  %v53_v14 = vld [vmem:[#allocation2] sm:$0x1] }
  0x2c   :  { %v697_v13 = vld [vmem:[#allocation5 + $0xa4] ss:$36 sps:$4 sm:$0xff]   ;;  %v700_v15 = vld [vmem:[#allocation5 + $0xac] ss:$36 sps:$4 sm:$0xff]   ;;  %v703_v18 = vld [vmem:[#allocation5 + $0x5c] ss:$36 sps:$4 sm:$0xff]  }
  0x2d   :  { %v695_v16 = vld [vmem:[#allocation5 + $0xa0] ss:$36 sps:$4 sm:$0xff]   ;;  %v698_v17 = vld [vmem:[#allocation5 + $0xa8] ss:$36 sps:$4 sm:$0xff]   ;;  %v701_v20 = vld [vmem:[#allocation5 + $0x58] ss:$36 sps:$4 sm:$0xff]  }
  0x2e   :  { %288 = vmatpush1.bf16.msra.mxu0 %v687_v7  ;;  %329 = vmatpush1.bf16.msra.mxu1 %v688_v8  ;;  %v706_v19 = vld [vmem:[#allocation5 + $0x64] ss:$36 sps:$4 sm:$0xff]   ;;  %v709_v22 = vld [vmem:[#allocation5 + $0x14] ss:$36 sps:$4 sm:$0xff]   ;;  %v712_v23 = vld [vmem:[#allocation5 + $0x1c] ss:$36 sps:$4 sm:$0xff]  }
  0x2f   :  { %289 = vmatprep.subr.bf16.mxu0 %v689_v9  ;;  %330 = vmatprep.subr.bf16.mxu1 %v691_v10  ;;  %v704_v21 = vld [vmem:[#allocation5 + $0x60] ss:$36 sps:$4 sm:$0xff]   ;;  %v707_v24 = vld [vmem:[#allocation5 + $0x10] ss:$36 sps:$4 sm:$0xff]   ;;  %v710_v25 = vld [vmem:[#allocation5 + $0x18] ss:$36 sps:$4 sm:$0xff]  }
  0x30   :  { %v713_v26 = vld [vmem:[#allocation5 + $0xb0] ss:$36 sps:$4 sm:$0xff]   ;;  %v844_v27 = vmov 0.0   ;;  %v714_v28 = vld [vmem:[#allocation5 + $0x68] ss:$36 sps:$4 sm:$0xff]   ;;  %vm845_vm1 = vmmov 0  }
  0x31   :  { %v715_v29 = vld [vmem:[#allocation5 + $0x20] ss:$36 sps:$4 sm:$0xff]   ;;  %v883_v31 = vshrl.u32 %v226_v30, 7  ;;  %v84_v34 = vld [vmem:[#allocation7] sm:$0xff]  ;;  %s847_s0 = smov [#allocation8]   ;;  %vm601_vm2 = vcmp.lt.s32.totalorder %v226_v30, 128 }
  0x32   :  { %290 = vmatpush1.bf16.msra.mxu0 %v693_v11  ;;  %331 = vmatpush1.bf16.msra.mxu1 %v694_v12  ;;  %s610_s2 = sshll.u32 %s847_s0, 4  ;;  %s611_s2 = int_to_ptr.vmem [resolvable:$true] %s610_s2 }
  0x33   :  { %367 = vmatprep.subr.bf16.mxu0 %v697_v13  ;;  %408 = vmatprep.subr.bf16.mxu1 %v700_v15  ;;  %v228_v32 = vsub.s32 0, %v883_v31  ;;  %v236_v33 = vsub.s32 2, %v883_v31  ;;  %v232_v35 = vsub.s32 1, %v883_v31  ;;  %v240_v36 = vsub.s32 3, %v883_v31  ;;  %s812_s30 = scalar_lea.vmem %s611_s2, 144  ;;  %s816_s4 = scalar_lea.vmem %s611_s2, 160 }
  0x34   :  { %v244_v53 = vsub.s32 4, %v883_v31  ;;  %v252_v54 = vsub.s32 6, %v883_v31  ;;  %v248_v61 = vsub.s32 5, %v883_v31  ;;  %p813_p1 = scmp.ne.s32.totalorder %s611_s2, %s812_s30  ;;  %p817_p2 = scmp.lt.s32.totalorder %s611_s2, %s611_s2 }
  0x35   :  { %648 = vmatmul.mubr.msk.bf16.vlgmr.msra.gmra.mxu0 %vm271_vm0, %v53_v14  ;;  %649 = vmatmul.mubr.msk.bf16.vlgmr.msra.gmra.mxu1 %vm271_vm0, %v53_v14  ;;  %v229_v37 = vrot.slane %v84_v34, %v228_v32  ;;  %v237_v38 = vrot.slane %v84_v34, %v236_v33  ;;  %v233_v39 = vrot.slane %v84_v34, %v232_v35  ;;  %p818_p3 = scmp.lt.s32.totalorder %s816_s4, %s812_s30 }
  0x36   :  { %368 = vmatpush1.bf16.msra.mxu0 %v695_v16  ;;  %409 = vmatpush1.bf16.msra.mxu1 %v698_v17  ;;  %v241_v40 = vrot.slane %v84_v34, %v240_v36  ;;  %v245_v1 = vrot.slane %v84_v34, %v244_v53  ;;  %v253_v2 = vrot.slane %v84_v34, %v252_v54 }
  0x37   :  { %369 = vmatprep.subr.bf16.mxu0 %v703_v18  ;;  %410 = vmatprep.subr.bf16.mxu1 %v706_v19  ;;  %v249_v3 = vrot.slane %v84_v34, %v248_v61  ;;  %p819_p4 = por %p818_p3, %p817_p2 }
  0x38   :  { %389 = vmatprep.mubr.bf16.mxu0 %v843_v0  ;;  %430 = vmatprep.mubr.bf16.mxu1 %v843_v0  ;;  %v256_v0 = vsub.s32 7, %v883_v31 }
  0x39   :  { %p820_p5 = pnand %p819_p4, %p813_p1 }
  0x3a   :  { %370 = vmatpush1.bf16.msra.mxu0 %v701_v20  ;;  %411 = vmatpush1.bf16.msra.mxu1 %v704_v21  ;;  %v257_v4 = vrot.slane %v84_v34, %v256_v0 }
  0x3b   :  { %371 = vmatprep.subr.bf16.mxu0 %v709_v22  ;;  %412 = vmatprep.subr.bf16.mxu1 %v712_v23 }
  0x3e   :  { %372 = vmatpush1.bf16.msra.mxu0 %v707_v24  ;;  %413 = vmatpush1.bf16.msra.mxu1 %v710_v25 }
  0x3f   :  { %657 = vmatprep.subr.bf16.mxu0 %v844_v27 }
  0x41   :  { %650 = vmatmul.mubr.msk.bf16.vlgmr.msra.gmra.mxu0 %vm271_vm0, %v53_v14  ;;  %651 = vmatmul.mubr.msk.bf16.vlgmr.msra.gmra.mxu1 %vm271_vm0, %v53_v14 }
  0x42   :  { %658 = vmatpush3.bf16.msra.mxu0 %v713_v26  ;;  %663 = vmatprep.mubr.msk.bf16.mxu0 %vm845_vm1, %v844_v27 }
  0x43   :  { %659 = vmatprep.subr.bf16.mxu0 %v844_v27 }
  0x46   :  { %660 = vmatpush3.bf16.msra.mxu0 %v714_v28  ;;  %v647_v28 = vld [vmem:[#allocation7 + $0x8] ss:$0 sm:$0xff] }
  0x47   :  { %661 = vmatprep.subr.bf16.mxu0 %v844_v27 }
  0x4a   :  { %662 = vmatpush3.bf16.msra.mxu0 %v715_v29 }
  0x4d   :  { %664 = vmatmul.mubr.msk.bf16.vlgmr.msra.gmra.mxu0 %vm271_vm0, %v53_v14 }
  0xf5   :  { %v309_v41 = vpop.f32.mrf.mxu0  ;;  %v350_v42 = vpop.f32.mrf.mxu1 }
  0xf6   :  { %v310_v43 = vadd.f32 %v309_v41, %v229_v37  ;;  %v351_v44 = vadd.f32 %v350_v42, %v237_v38 }
  0xf7   :  { %v311_v45 = vpop.f32.mrf.mxu0  ;;  %v352_v46 = vpop.f32.mrf.mxu1 }
  0xf8   :  { %v479_v47 = vsub.f32 0.0, %v310_v43  ;;  %v481_v48 = vsub.f32 0.0, %v351_v44  ;;  %v312_v49 = vadd.f32 %v311_v45, %v233_v39  ;;  %v353_v50 = vadd.f32 %v352_v46, %v241_v40 }
  0xf9   :  { %v313_v51 = vpop.f32.mrf.mxu0  ;;  %v354_v52 = vpop.f32.mrf.mxu1 }
  0xfa   :  { %v488_v55 = vmul.f32 1.442695, %v479_v47  ;;  %v492_v56 = vmul.f32 1.442695, %v481_v48  ;;  %v480_v57 = vsub.f32 0.0, %v312_v49  ;;  %v482_v58 = vsub.f32 0.0, %v353_v50 }
  0xfb   :  { %v314_v59 = vpop.f32.mrf.mxu0  ;;  %v355_v60 = vpop.f32.mrf.mxu1  ;;  %v846_v51 = vmov 1966171168  }
  0xfc   :  { %716 = vpow2.f32 %v488_v55  ;;  %v490_v62 = vmul.f32 1.442695, %v480_v57  ;;  %v494_v63 = vmul.f32 1.442695, %v482_v58  ;;  %v538_v52 = vunpack.c.l.s4 %v846_v51 }
  0xfd   :  { %718 = vpow2.f32 %v492_v56 }
  0xfe   :  { %720 = vpow2.f32 %v490_v62  ;;  %v539_v56 = vunpack.c.0.s8 %v538_v52 }
  0xff   :  { %722 = vpow2.f32 %v494_v63 }
 0x100   :  { %v542_v62 = vsub.s32 %v539_v56, %v883_v31 }
 0x101   :  { %v391_v5 = vpop.f32.mrf.mxu0  ;;  %v432_v6 = vpop.f32.mrf.mxu1 }
 0x102   :  { %v392_v7 = vadd.f32 %v391_v5, %v245_v1  ;;  %v433_v8 = vadd.f32 %v432_v6, %v253_v2 }
 0x103   :  { %v393_v9 = vpop.f32.mrf.mxu0  ;;  %v434_v10 = vpop.f32.mrf.mxu1 }
 0x104   :  { %v483_v11 = vsub.f32 0.0, %v392_v7  ;;  %v485_v12 = vsub.f32 0.0, %v433_v8  ;;  %v394_v13 = vadd.f32 %v393_v9, %v249_v3  ;;  %v435_v14 = vadd.f32 %v434_v10, %v257_v4 }
 0x105   :  { %v395_v15 = vpop.f32.mrf.mxu0  ;;  %v436_v16 = vpop.f32.mrf.mxu1 }
 0x106   :  { %v496_v17 = vmul.f32 1.442695, %v483_v11  ;;  %v500_v18 = vmul.f32 1.442695, %v485_v12  ;;  %v484_v19 = vsub.f32 0.0, %v394_v13  ;;  %v486_v20 = vsub.f32 0.0, %v435_v14 }
 0x107   :  { %v396_v21 = vpop.f32.mrf.mxu0  ;;  %v437_v22 = vpop.f32.mrf.mxu1 }
 0x108   :  { %724 = vpow2.f32 %v496_v17  ;;  %v498_v23 = vmul.f32 1.442695, %v484_v19  ;;  %v502_v24 = vmul.f32 1.442695, %v486_v20 }
 0x109   :  { %v717_v25 = vpop.eup %716  ;;  %726 = vpow2.f32 %v500_v18 }
 0x10a   :  { %v719_v26 = vpop.eup %718  ;;  %728 = vpow2.f32 %v498_v23  ;;  %v506_v32 = vadd.f32 1.0, %v717_v25 }
 0x10b   :  { %v721_v27 = vpop.eup %720  ;;  %730 = vpow2.f32 %v502_v24  ;;  %v508_v33 = vadd.f32 1.0, %v719_v26 }
 0x10c   :  { %v723_v29 = vpop.eup %722  ;;  %v507_v35 = vadd.f32 1.0, %v721_v27  ;;  %732 = vrcp.f32 %v506_v32 }
 0x10d   :  { %v473_v34 = vpop.f32.mrf.mxu0  ;;  %v509_v37 = vadd.f32 1.0, %v723_v29  ;;  %734 = vrcp.f32 %v508_v33 }
 0x10e   :  { %v474_v36 = vadd.f32 %v647_v28, %v473_v34  ;;  %736 = vrcp.f32 %v507_v35 }
 0x10f   :  { %v665_v38 = vpop.f32.mrf.mxu0  ;;  %738 = vrcp.f32 %v509_v37 }
 0x110   :  { %v487_v39 = vsub.f32 0.0, %v474_v36 }
 0x111   :  { %v476_v40 = vpop.f32.mrf.mxu0 }
 0x112   :  { %v504_v41 = vmul.f32 1.442695, %v487_v39 }
 0x113   :  { %v666_v42 = vpop.f32.mrf.mxu0 }
 0x114   :  { %740 = vpow2.f32 %v504_v41 }
 0x115   :  { %v725_v43 = vpop.eup %724 }
 0x116   :  { %v727_v44 = vpop.eup %726  ;;  %v510_v45 = vadd.f32 1.0, %v725_v43 }
 0x117   :  { %v729_v46 = vpop.eup %728  ;;  %v512_v47 = vadd.f32 1.0, %v727_v44 }
 0x118   :  { %v731_v48 = vpop.eup %730  ;;  %742 = vrcp.f32 %v510_v45  ;;  %v511_v49 = vadd.f32 1.0, %v729_v46 }
 0x119   :  { %744 = vrcp.f32 %v512_v47  ;;  %v513_v50 = vadd.f32 1.0, %v731_v48  ;;  %v733_v53 = vpop.eup %732 }
 0x11a   :  { %746 = vrcp.f32 %v511_v49  ;;  %v735_v54 = vpop.eup %734 }
 0x11b   :  { %748 = vrcp.f32 %v513_v50  ;;  %v737_v55 = vpop.eup %736 }
 0x11c   :  { %v739_v57 = vpop.eup %738  ;;  %v533_v60 = vcombine.low %v733_v53, %v737_v55 }
 0x11d   :  { %v534_v61 = vcombine.low %v735_v54, %v739_v57 }
 0x11e   :  { %v543_v2 = vrot.slane %v533_v60, %v542_v62 }
 0x11f   :  { %v550_v3 = vrot.slane %v534_v61, %v542_v62 }
 0x121   :  { %v741_v58 = vpop.eup %740  ;;  %v565_v9 = vcombine.low %v543_v2, %v550_v3 }
 0x122   :  { %v514_v59 = vadd.f32 1.0, %v741_v58 }
 0x123   :  { %v573_v11 = vrot.slane %v565_v9, %v542_v62 }
 0x124   :  { %750 = vrcp.f32 %v514_v59 }
 0x125   :  { %v743_v63 = vpop.eup %742 }
 0x126   :  { %v745_v0 = vpop.eup %744 }
 0x127   :  { %v747_v1 = vpop.eup %746 }
 0x128   :  { %v749_v4 = vpop.eup %748  ;;  %v535_v5 = vcombine.low %v743_v63, %v747_v1 }
 0x129   :  { %v536_v6 = vcombine.low %v745_v0, %v749_v4 }
 0x12a   :  { %v557_v7 = vrot.slane %v535_v5, %v542_v62 }
 0x12b   :  { %v564_v8 = vrot.slane %v536_v6, %v542_v62 }
 0x12d   :  { %v566_v10 = vcombine.low %v557_v7, %v564_v8 }
 0x12f   :  { %v580_v12 = vrot.slane %v566_v10, %v542_v62 }
 0x131   :  { %v751_v13 = vpop.eup %750  ;;  %v581_v14 = vcombine.low %v573_v11, %v580_v12 }
 0x132   :  { %v588_v31 = vrot.slane %v751_v13, %v542_v62 }
 0x133   :  { %598 = vst [vmem:[#allocation8] sm:$0xff] %v581_v14 }
 0x134   :  { %v595_v15 = vrot.slane %v588_v31, %v542_v62 }
 0x136   :  { %603 = vst.msk [vmem:[#allocation8 + $0x8] sm:$0x1] %vm601_vm2, %v595_v15 }
 0x137   :  { %823 = shalt.err (!%p820_p5)
}
 0x138   :  { %613 = dma.vmem_to_hbm [thread:$0]  %s611_s2, 144, %s901_s3, [#allocation4]  }
 0x139   :  { %836 = dma.done.wait [#allocation4], 144  }
 0x13a   :  { %837 = vsyncadd [#allocation4], 4294967152 }
 0x13b   :  { %617 = vsyncpa [#allocation3], 1 }
 0x13c   :  { %618 = vsyncpa [#allocation6], 1 }
 0x13d   :  { %619 = vsyncpa [#allocation4], 1 }

</bundles_post_ra>
